<compile_context>
chip_gen: v6e
topology: v6e:2x2x1
jax: 0.10.0
libtpu: 0.0.40
codegen_flags: <defaults>
</compile_context>

<pallas_src>
import jax
import jax.numpy as jnp
from jax.experimental import pallas as pl
from jax.experimental.pallas import tpu as pltpu

K1 = 3
K2 = 3
C_HID = 64
FC_HID = 84
SUBLANE = 8          # sublane group size -> batch-interleave stride


def lenet5_kernel(x_ref, slab_ref, w2_ref, fc1w_ref, fc2w_ref, fc2b_ref,
                  out_ref):
    """Batched forward pass, single invocation, stride-8 batch interleave.

    Row layout of every activation slab is r = position*PB + b with PB = 8
    (rows b >= batch are padding), so every row slice below starts at a
    multiple of 8 sublanes and is a free view.

    x_ref   : (S*PB, 1)    x_col[s*PB + b, 0]   = x[b, s]
    slab_ref: (8, 128)     rows 0..2, cols 0..64 = conv1 weight [k, c]
                           row 3,     cols 0..64 = conv1 bias
                           row 4,     cols 0..64 = conv2 bias
                           row 5,     cols 0..84 = fc1 bias
    w2_ref  : (192, 64)    w2s[k*64 + ci, co]    = conv2.weight[co, ci, k]
    fc1w_ref: (64*L2, 84)  fc1ws[t*64 + c, o]    = fc1.weight[o, c*L2 + t]
    fc2w_ref: (84, P)      fc2.weight transposed
    fc2b_ref: (1, P)
    out_ref : (PB, P)      rows >= batch are don't-care
    """
    PB = out_ref.shape[0]
    S = x_ref.shape[0] // PB
    L1 = S - K1 + 1
    L2 = L1 - K2 + 1
    LB1 = L1 * PB
    LB2 = L2 * PB

    x = x_ref[...]                                         # (S*PB, 1)
    slab = slab_ref[...]                                   # (8, 128)
    b1 = slab[3:4, 0:C_HID]
    b2 = slab[4:5, 0:C_HID]
    fc1b = slab[5:6, 0:FC_HID]

    # conv1 on the VPU: 3 broadcast FMAs over 8-aligned row-shifted views.
    h1 = (x[0:LB1, :] * slab[0:1, 0:C_HID]
          + x[PB:PB + LB1, :] * slab[1:2, 0:C_HID]
          + x[2 * PB:2 * PB + LB1, :] * slab[2:3, 0:C_HID]
          + b1)
    h1 = jnp.tanh(h1)                                      # (L1*PB, 64)

    # conv2: 3 accumulating (LB2,64)@(64,64) MXU matmuls over 8-aligned
    # row-shifted views of h1 -- no im2col lane concatenation.
    acc2 = jnp.dot(h1[0:LB2, :], w2_ref[0:C_HID, :],
                   preferred_element_type=jnp.float32)
    acc2 = acc2 + jnp.dot(h1[PB:PB + LB2, :], w2_ref[C_HID:2 * C_HID, :],
                          preferred_element_type=jnp.float32)
    acc2 = acc2 + jnp.dot(h1[2 * PB:2 * PB + LB2, :],
                          w2_ref[2 * C_HID:3 * C_HID, :],
                          preferred_element_type=jnp.float32)
    h2 = jnp.tanh(acc2 + b2)                               # (L2*PB, 64)

    # fc1: the PyTorch channel-major flatten is absorbed into the
    # pre-permuted fc1 weight layout, so fc1 is L2 accumulating
    # (PB,64)@(64,84) MXU matmuls with whole-sublane-group slices
    # (no 12-piece lane concat).
    acc = None
    for t in range(L2):
        d = jnp.dot(h2[t * PB:(t + 1) * PB, :],
                    fc1w_ref[t * C_HID:(t + 1) * C_HID, :],
                    preferred_element_type=jnp.float32)
        acc = d if acc is None else acc + d
    h3 = jnp.tanh(acc + fc1b)                              # (PB, 84)

    # fc2 + single slab store for the whole (padded) batch.
    out_ref[...] = (jnp.dot(h3, fc2w_ref[...],
                            preferred_element_type=jnp.float32)
                    + fc2b_ref[...])                       # (PB, P)


def init_params(key, seq_len, pred_len):
    exp = seq_len - K1 + 1 - K2 + 1
    ks = jax.random.split(key, 8)
    scale = 0.1
    return {
        "w1": scale * jax.random.normal(ks[0], (C_HID, 1, K1), jnp.float32),
        "b1": scale * jax.random.normal(ks[1], (C_HID,), jnp.float32),
        "w2": scale * jax.random.normal(ks[2], (C_HID, C_HID, K2), jnp.float32),
        "b2": scale * jax.random.normal(ks[3], (C_HID,), jnp.float32),
        "fc1w": scale * jax.random.normal(ks[4], (FC_HID, C_HID * exp), jnp.float32),
        "fc1b": scale * jax.random.normal(ks[5], (FC_HID,), jnp.float32),
        "fc2w": scale * jax.random.normal(ks[6], (pred_len, FC_HID), jnp.float32),
        "fc2b": scale * jax.random.normal(ks[7], (pred_len,), jnp.float32),
    }


def prepare_params(params, seq_len):
    """One-time permutation of weights into kernel layout (off the hot path)."""
    L1 = seq_len - K1 + 1
    L2 = L1 - K2 + 1
    assert L2 >= 1, "seq_len must be >= 5 for two k=3 valid convolutions"

    w1t = jnp.transpose(params["w1"][:, 0, :])             # (3, 64)
    slab = jnp.zeros((SUBLANE, 128), jnp.float32)
    slab = slab.at[0:K1, 0:C_HID].set(w1t)
    slab = slab.at[K1, 0:C_HID].set(params["b1"])
    slab = slab.at[K1 + 1, 0:C_HID].set(params["b2"])
    slab = slab.at[K1 + 2, 0:FC_HID].set(params["fc1b"])

    w2s = jnp.transpose(params["w2"], (2, 1, 0)).reshape(K2 * C_HID, C_HID)
    fc1ws = (params["fc1w"].reshape(FC_HID, C_HID, L2)
             .transpose(2, 1, 0).reshape(L2 * C_HID, FC_HID))
    fc2wt = jnp.transpose(params["fc2w"])                  # (84, P)
    fc2b = params["fc2b"][None, :]                         # (1, P)

    return {"slab": slab, "w2s": w2s, "fc1ws": fc1ws,
            "fc2wt": fc2wt, "fc2b": fc2b}


@jax.jit
def lenet5_forward(x, kp):
    """x: (B, seq_len, 1) f32, kp = prepare_params(...)  ->  (B, pred_len, 1)."""
    B, S, _ = x.shape
    L1 = S - K1 + 1
    L2 = L1 - K2 + 1
    P = kp["fc2wt"].shape[1]
    PB = ((B + SUBLANE - 1) // SUBLANE) * SUBLANE
    LB1, LB2 = L1 * PB, L2 * PB
    assert kp["fc1ws"].shape[0] == L2 * C_HID, "params/seq_len mismatch"

    # Only per-call layout work: interleave/zero-pad x to (S*PB, 1), stride 8.
    xt = jnp.transpose(x[:, :, 0])                         # (S, B)
    x_col = jnp.pad(xt, ((0, 0), (0, PB - B))).reshape(S * PB, 1)

    flops = 2 * (LB1 * C_HID * K1
                 + LB2 * C_HID * (K2 * C_HID)
                 + PB * (C_HID * L2) * FC_HID
                 + PB * FC_HID * P)
    transcendentals = LB1 * C_HID + LB2 * C_HID + PB * FC_HID
    bytes_accessed = 4 * (x_col.size + kp["slab"].size + kp["w2s"].size
                          + kp["fc1ws"].size + kp["fc2wt"].size
                          + kp["fc2b"].size + PB * P)

    vmem = pl.BlockSpec(memory_space=pltpu.MemorySpace.VMEM)
    out = pl.pallas_call(
        lenet5_kernel,
        out_shape=jax.ShapeDtypeStruct((PB, P), jnp.float32),
        in_specs=[vmem] * 6,
        out_specs=vmem,
        cost_estimate=pl.CostEstimate(flops=flops,
                                      transcendentals=transcendentals,
                                      bytes_accessed=bytes_accessed),
    )(x_col, kp["slab"], kp["w2s"], kp["fc1ws"], kp["fc2wt"], kp["fc2b"])

    return out[:B, :, None]                                # (B, P, 1)


def reference_forward(x, params, pred_len):
    """Pure-JAX reference matching the PyTorch module semantics."""
    B, S, _ = x.shape
    L1 = S - K1 + 1
    L2 = L1 - K2 + 1
    xc = jnp.transpose(x, (0, 2, 1))                                  # (B, 1, S)

    cols1 = jnp.stack([xc[:, 0, k:k + L1] for k in range(K1)], axis=1)  # (B,3,L1)
    h1 = jnp.tanh(jnp.einsum("ok,bkt->bot", params["w1"][:, 0, :], cols1)
                  + params["b1"][None, :, None])                      # (B,64,L1)
    cols2 = jnp.stack([h1[:, :, k:k + L2] for k in range(K2)], axis=2)  # (B,64,3,L2)
    h2 = jnp.tanh(jnp.einsum("ock,bckt->bot", params["w2"], cols2)
                  + params["b2"][None, :, None])                      # (B,64,L2)
    flat = h2.reshape(B, -1)                                          # channel-major
    h3 = jnp.tanh(flat @ params["fc1w"].T + params["fc1b"])
    out = h3 @ params["fc2w"].T + params["fc2b"]
    return out[..., None]                                             # (B, P, 1)


if __name__ == "__main__":
    seq_len, pred_len, batch = 16, 8, 2
    key = jax.random.PRNGKey(0)
    k_x, k_p = jax.random.split(key)

    x = jax.random.normal(k_x, (batch, seq_len, 1), jnp.float32)
    params = init_params(k_p, seq_len, pred_len)
    kparams = jax.tree_util.tree_map(jax.block_until_ready,
                                     prepare_params(params, seq_len))

    out = lenet5_forward(x, kparams)
    out = jax.block_until_ready(out)

    ref = reference_forward(x, params, pred_len)
    assert out.shape == (batch, pred_len, 1), out.shape
    assert jnp.allclose(out, ref, atol=5e-5, rtol=5e-5), (
        "mismatch vs reference: max abs err "
        f"{float(jnp.max(jnp.abs(out - ref)))}")

    print("KERNEL_OK")
</pallas_src>

<mosaic_0001>
module attributes {stable_mosaic.version = 11 : i64} {
  func.func @lenet5_kernel(%arg0: memref<128x1xf32, #tpu.memory_space<vmem>>, %arg1: memref<8x128xf32, #tpu.memory_space<vmem>>, %arg2: memref<192x64xf32, #tpu.memory_space<vmem>>, %arg3: memref<768x84xf32, #tpu.memory_space<vmem>>, %arg4: memref<84x8xf32, #tpu.memory_space<vmem>>, %arg5: memref<1x8xf32, #tpu.memory_space<vmem>>, %arg6: memref<8x8xf32, #tpu.memory_space<vmem>>) attributes {dimension_semantics = [], scalar_prefetch = 0 : i64, scratch_operands = 0 : i64, tpu.core_type = #tpu.core_type<tc>} {
    %c0 = arith.constant 0 : index
    %c0_0 = arith.constant 0 : index
    %0 = vector.load %arg0[%c0, %c0_0] : memref<128x1xf32, #tpu.memory_space<vmem>>, vector<128x1xf32>
    %c0_1 = arith.constant 0 : index
    %c0_2 = arith.constant 0 : index
    %1 = vector.load %arg1[%c0_1, %c0_2] : memref<8x128xf32, #tpu.memory_space<vmem>>, vector<8x128xf32>
    %2 = vector.extract_strided_slice %1 {offsets = [3, 0], sizes = [1, 64], strides = [1, 1]} : vector<8x128xf32> to vector<1x64xf32>
    %3 = vector.extract_strided_slice %1 {offsets = [4, 0], sizes = [1, 64], strides = [1, 1]} : vector<8x128xf32> to vector<1x64xf32>
    %4 = vector.extract_strided_slice %1 {offsets = [5, 0], sizes = [1, 84], strides = [1, 1]} : vector<8x128xf32> to vector<1x84xf32>
    %5 = vector.extract_strided_slice %0 {offsets = [0, 0], sizes = [112, 1], strides = [1, 1]} : vector<128x1xf32> to vector<112x1xf32>
    %6 = vector.extract_strided_slice %1 {offsets = [0, 0], sizes = [1, 64], strides = [1, 1]} : vector<8x128xf32> to vector<1x64xf32>
    %7 = vector.broadcast %5 : vector<112x1xf32> to vector<112x64xf32>
    %8 = vector.broadcast %6 : vector<1x64xf32> to vector<112x64xf32>
    %9 = arith.mulf %7, %8 : vector<112x64xf32>
    %10 = vector.extract_strided_slice %0 {offsets = [8, 0], sizes = [112, 1], strides = [1, 1]} : vector<128x1xf32> to vector<112x1xf32>
    %11 = vector.extract_strided_slice %1 {offsets = [1, 0], sizes = [1, 64], strides = [1, 1]} : vector<8x128xf32> to vector<1x64xf32>
    %12 = vector.broadcast %10 : vector<112x1xf32> to vector<112x64xf32>
    %13 = vector.broadcast %11 : vector<1x64xf32> to vector<112x64xf32>
    %14 = arith.mulf %12, %13 : vector<112x64xf32>
    %15 = arith.addf %9, %14 : vector<112x64xf32>
    %16 = vector.extract_strided_slice %0 {offsets = [16, 0], sizes = [112, 1], strides = [1, 1]} : vector<128x1xf32> to vector<112x1xf32>
    %17 = vector.extract_strided_slice %1 {offsets = [2, 0], sizes = [1, 64], strides = [1, 1]} : vector<8x128xf32> to vector<1x64xf32>
    %18 = vector.broadcast %16 : vector<112x1xf32> to vector<112x64xf32>
    %19 = vector.broadcast %17 : vector<1x64xf32> to vector<112x64xf32>
    %20 = arith.mulf %18, %19 : vector<112x64xf32>
    %21 = arith.addf %15, %20 : vector<112x64xf32>
    %22 = vector.broadcast %2 : vector<1x64xf32> to vector<112x64xf32>
    %23 = arith.addf %21, %22 : vector<112x64xf32>
    %24 = math.tanh %23 : vector<112x64xf32>
    %25 = vector.extract_strided_slice %24 {offsets = [0, 0], sizes = [96, 64], strides = [1, 1]} : vector<112x64xf32> to vector<96x64xf32>
    %c0_3 = arith.constant 0 : index
    %c0_4 = arith.constant 0 : index
    %26 = vector.load %arg2[%c0_3, %c0_4] : memref<192x64xf32, #tpu.memory_space<vmem>>, vector<64x64xf32>
    %cst = arith.constant dense<0.000000e+00> : vector<96x64xf32>
    %27 = tpu.matmul %25, %26, %cst {dimension_numbers = #tpu.dot_dimension_numbers<[1], [0], [0], [1], [0, 0, 1, 1], [], []>} : vector<96x64xf32>, vector<64x64xf32>, vector<96x64xf32> -> vector<96x64xf32>
    %28 = vector.extract_strided_slice %24 {offsets = [8, 0], sizes = [96, 64], strides = [1, 1]} : vector<112x64xf32> to vector<96x64xf32>
    %c64 = arith.constant 64 : index
    %c0_5 = arith.constant 0 : index
    %29 = vector.load %arg2[%c64, %c0_5] : memref<192x64xf32, #tpu.memory_space<vmem>>, vector<64x64xf32>
    %cst_6 = arith.constant dense<0.000000e+00> : vector<96x64xf32>
    %30 = tpu.matmul %28, %29, %cst_6 {dimension_numbers = #tpu.dot_dimension_numbers<[1], [0], [0], [1], [0, 0, 1, 1], [], []>} : vector<96x64xf32>, vector<64x64xf32>, vector<96x64xf32> -> vector<96x64xf32>
    %31 = arith.addf %27, %30 : vector<96x64xf32>
    %32 = vector.extract_strided_slice %24 {offsets = [16, 0], sizes = [96, 64], strides = [1, 1]} : vector<112x64xf32> to vector<96x64xf32>
    %c128 = arith.constant 128 : index
    %c0_7 = arith.constant 0 : index
    %33 = vector.load %arg2[%c128, %c0_7] : memref<192x64xf32, #tpu.memory_space<vmem>>, vector<64x64xf32>
    %cst_8 = arith.constant dense<0.000000e+00> : vector<96x64xf32>
    %34 = tpu.matmul %32, %33, %cst_8 {dimension_numbers = #tpu.dot_dimension_numbers<[1], [0], [0], [1], [0, 0, 1, 1], [], []>} : vector<96x64xf32>, vector<64x64xf32>, vector<96x64xf32> -> vector<96x64xf32>
    %35 = arith.addf %31, %34 : vector<96x64xf32>
    %36 = vector.broadcast %3 : vector<1x64xf32> to vector<96x64xf32>
    %37 = arith.addf %35, %36 : vector<96x64xf32>
    %38 = math.tanh %37 : vector<96x64xf32>
    %39 = vector.extract_strided_slice %38 {offsets = [0, 0], sizes = [8, 64], strides = [1, 1]} : vector<96x64xf32> to vector<8x64xf32>
    %c0_9 = arith.constant 0 : index
    %c0_10 = arith.constant 0 : index
    %40 = vector.load %arg3[%c0_9, %c0_10] : memref<768x84xf32, #tpu.memory_space<vmem>>, vector<64x84xf32>
    %cst_11 = arith.constant dense<0.000000e+00> : vector<8x84xf32>
    %41 = tpu.matmul %39, %40, %cst_11 {dimension_numbers = #tpu.dot_dimension_numbers<[1], [0], [0], [1], [0, 0, 1, 1], [], []>} : vector<8x64xf32>, vector<64x84xf32>, vector<8x84xf32> -> vector<8x84xf32>
    %42 = vector.extract_strided_slice %38 {offsets = [8, 0], sizes = [8, 64], strides = [1, 1]} : vector<96x64xf32> to vector<8x64xf32>
    %c64_12 = arith.constant 64 : index
    %c0_13 = arith.constant 0 : index
    %43 = vector.load %arg3[%c64_12, %c0_13] : memref<768x84xf32, #tpu.memory_space<vmem>>, vector<64x84xf32>
    %cst_14 = arith.constant dense<0.000000e+00> : vector<8x84xf32>
    %44 = tpu.matmul %42, %43, %cst_14 {dimension_numbers = #tpu.dot_dimension_numbers<[1], [0], [0], [1], [0, 0, 1, 1], [], []>} : vector<8x64xf32>, vector<64x84xf32>, vector<8x84xf32> -> vector<8x84xf32>
    %45 = arith.addf %41, %44 : vector<8x84xf32>
    %46 = vector.extract_strided_slice %38 {offsets = [16, 0], sizes = [8, 64], strides = [1, 1]} : vector<96x64xf32> to vector<8x64xf32>
    %c128_15 = arith.constant 128 : index
    %c0_16 = arith.constant 0 : index
    %47 = vector.load %arg3[%c128_15, %c0_16] : memref<768x84xf32, #tpu.memory_space<vmem>>, vector<64x84xf32>
    %cst_17 = arith.constant dense<0.000000e+00> : vector<8x84xf32>
    %48 = tpu.matmul %46, %47, %cst_17 {dimension_numbers = #tpu.dot_dimension_numbers<[1], [0], [0], [1], [0, 0, 1, 1], [], []>} : vector<8x64xf32>, vector<64x84xf32>, vector<8x84xf32> -> vector<8x84xf32>
    %49 = arith.addf %45, %48 : vector<8x84xf32>
    %50 = vector.extract_strided_slice %38 {offsets = [24, 0], sizes = [8, 64], strides = [1, 1]} : vector<96x64xf32> to vector<8x64xf32>
    %c192 = arith.constant 192 : index
    %c0_18 = arith.constant 0 : index
    %51 = vector.load %arg3[%c192, %c0_18] : memref<768x84xf32, #tpu.memory_space<vmem>>, vector<64x84xf32>
    %cst_19 = arith.constant dense<0.000000e+00> : vector<8x84xf32>
    %52 = tpu.matmul %50, %51, %cst_19 {dimension_numbers = #tpu.dot_dimension_numbers<[1], [0], [0], [1], [0, 0, 1, 1], [], []>} : vector<8x64xf32>, vector<64x84xf32>, vector<8x84xf32> -> vector<8x84xf32>
    %53 = arith.addf %49, %52 : vector<8x84xf32>
    %54 = vector.extract_strided_slice %38 {offsets = [32, 0], sizes = [8, 64], strides = [1, 1]} : vector<96x64xf32> to vector<8x64xf32>
    %c256 = arith.constant 256 : index
    %c0_20 = arith.constant 0 : index
    %55 = vector.load %arg3[%c256, %c0_20] : memref<768x84xf32, #tpu.memory_space<vmem>>, vector<64x84xf32>
    %cst_21 = arith.constant dense<0.000000e+00> : vector<8x84xf32>
    %56 = tpu.matmul %54, %55, %cst_21 {dimension_numbers = #tpu.dot_dimension_numbers<[1], [0], [0], [1], [0, 0, 1, 1], [], []>} : vector<8x64xf32>, vector<64x84xf32>, vector<8x84xf32> -> vector<8x84xf32>
    %57 = arith.addf %53, %56 : vector<8x84xf32>
    %58 = vector.extract_strided_slice %38 {offsets = [40, 0], sizes = [8, 64], strides = [1, 1]} : vector<96x64xf32> to vector<8x64xf32>
    %c320 = arith.constant 320 : index
    %c0_22 = arith.constant 0 : index
    %59 = vector.load %arg3[%c320, %c0_22] : memref<768x84xf32, #tpu.memory_space<vmem>>, vector<64x84xf32>
    %cst_23 = arith.constant dense<0.000000e+00> : vector<8x84xf32>
    %60 = tpu.matmul %58, %59, %cst_23 {dimension_numbers = #tpu.dot_dimension_numbers<[1], [0], [0], [1], [0, 0, 1, 1], [], []>} : vector<8x64xf32>, vector<64x84xf32>, vector<8x84xf32> -> vector<8x84xf32>
    %61 = arith.addf %57, %60 : vector<8x84xf32>
    %62 = vector.extract_strided_slice %38 {offsets = [48, 0], sizes = [8, 64], strides = [1, 1]} : vector<96x64xf32> to vector<8x64xf32>
    %c384 = arith.constant 384 : index
    %c0_24 = arith.constant 0 : index
    %63 = vector.load %arg3[%c384, %c0_24] : memref<768x84xf32, #tpu.memory_space<vmem>>, vector<64x84xf32>
    %cst_25 = arith.constant dense<0.000000e+00> : vector<8x84xf32>
    %64 = tpu.matmul %62, %63, %cst_25 {dimension_numbers = #tpu.dot_dimension_numbers<[1], [0], [0], [1], [0, 0, 1, 1], [], []>} : vector<8x64xf32>, vector<64x84xf32>, vector<8x84xf32> -> vector<8x84xf32>
    %65 = arith.addf %61, %64 : vector<8x84xf32>
    %66 = vector.extract_strided_slice %38 {offsets = [56, 0], sizes = [8, 64], strides = [1, 1]} : vector<96x64xf32> to vector<8x64xf32>
    %c448 = arith.constant 448 : index
    %c0_26 = arith.constant 0 : index
    %67 = vector.load %arg3[%c448, %c0_26] : memref<768x84xf32, #tpu.memory_space<vmem>>, vector<64x84xf32>
    %cst_27 = arith.constant dense<0.000000e+00> : vector<8x84xf32>
    %68 = tpu.matmul %66, %67, %cst_27 {dimension_numbers = #tpu.dot_dimension_numbers<[1], [0], [0], [1], [0, 0, 1, 1], [], []>} : vector<8x64xf32>, vector<64x84xf32>, vector<8x84xf32> -> vector<8x84xf32>
    %69 = arith.addf %65, %68 : vector<8x84xf32>
    %70 = vector.extract_strided_slice %38 {offsets = [64, 0], sizes = [8, 64], strides = [1, 1]} : vector<96x64xf32> to vector<8x64xf32>
    %c512 = arith.constant 512 : index
    %c0_28 = arith.constant 0 : index
    %71 = vector.load %arg3[%c512, %c0_28] : memref<768x84xf32, #tpu.memory_space<vmem>>, vector<64x84xf32>
    %cst_29 = arith.constant dense<0.000000e+00> : vector<8x84xf32>
    %72 = tpu.matmul %70, %71, %cst_29 {dimension_numbers = #tpu.dot_dimension_numbers<[1], [0], [0], [1], [0, 0, 1, 1], [], []>} : vector<8x64xf32>, vector<64x84xf32>, vector<8x84xf32> -> vector<8x84xf32>
    %73 = arith.addf %69, %72 : vector<8x84xf32>
    %74 = vector.extract_strided_slice %38 {offsets = [72, 0], sizes = [8, 64], strides = [1, 1]} : vector<96x64xf32> to vector<8x64xf32>
    %c576 = arith.constant 576 : index
    %c0_30 = arith.constant 0 : index
    %75 = vector.load %arg3[%c576, %c0_30] : memref<768x84xf32, #tpu.memory_space<vmem>>, vector<64x84xf32>
    %cst_31 = arith.constant dense<0.000000e+00> : vector<8x84xf32>
    %76 = tpu.matmul %74, %75, %cst_31 {dimension_numbers = #tpu.dot_dimension_numbers<[1], [0], [0], [1], [0, 0, 1, 1], [], []>} : vector<8x64xf32>, vector<64x84xf32>, vector<8x84xf32> -> vector<8x84xf32>
    %77 = arith.addf %73, %76 : vector<8x84xf32>
    %78 = vector.extract_strided_slice %38 {offsets = [80, 0], sizes = [8, 64], strides = [1, 1]} : vector<96x64xf32> to vector<8x64xf32>
    %c640 = arith.constant 640 : index
    %c0_32 = arith.constant 0 : index
    %79 = vector.load %arg3[%c640, %c0_32] : memref<768x84xf32, #tpu.memory_space<vmem>>, vector<64x84xf32>
    %cst_33 = arith.constant dense<0.000000e+00> : vector<8x84xf32>
    %80 = tpu.matmul %78, %79, %cst_33 {dimension_numbers = #tpu.dot_dimension_numbers<[1], [0], [0], [1], [0, 0, 1, 1], [], []>} : vector<8x64xf32>, vector<64x84xf32>, vector<8x84xf32> -> vector<8x84xf32>
    %81 = arith.addf %77, %80 : vector<8x84xf32>
    %82 = vector.extract_strided_slice %38 {offsets = [88, 0], sizes = [8, 64], strides = [1, 1]} : vector<96x64xf32> to vector<8x64xf32>
    %c704 = arith.constant 704 : index
    %c0_34 = arith.constant 0 : index
    %83 = vector.load %arg3[%c704, %c0_34] : memref<768x84xf32, #tpu.memory_space<vmem>>, vector<64x84xf32>
    %cst_35 = arith.constant dense<0.000000e+00> : vector<8x84xf32>
    %84 = tpu.matmul %82, %83, %cst_35 {dimension_numbers = #tpu.dot_dimension_numbers<[1], [0], [0], [1], [0, 0, 1, 1], [], []>} : vector<8x64xf32>, vector<64x84xf32>, vector<8x84xf32> -> vector<8x84xf32>
    %85 = arith.addf %81, %84 : vector<8x84xf32>
    %86 = vector.broadcast %4 : vector<1x84xf32> to vector<8x84xf32>
    %87 = arith.addf %85, %86 : vector<8x84xf32>
    %88 = math.tanh %87 : vector<8x84xf32>
    %c0_36 = arith.constant 0 : index
    %c0_37 = arith.constant 0 : index
    %89 = vector.load %arg4[%c0_36, %c0_37] : memref<84x8xf32, #tpu.memory_space<vmem>>, vector<84x8xf32>
    %cst_38 = arith.constant dense<0.000000e+00> : vector<8x8xf32>
    %90 = tpu.matmul %88, %89, %cst_38 {dimension_numbers = #tpu.dot_dimension_numbers<[1], [0], [0], [1], [0, 0, 1, 1], [], []>} : vector<8x84xf32>, vector<84x8xf32>, vector<8x8xf32> -> vector<8x8xf32>
    %c0_39 = arith.constant 0 : index
    %c0_40 = arith.constant 0 : index
    %91 = vector.load %arg5[%c0_39, %c0_40] : memref<1x8xf32, #tpu.memory_space<vmem>>, vector<1x8xf32>
    %92 = vector.broadcast %91 : vector<1x8xf32> to vector<8x8xf32>
    %93 = arith.addf %90, %92 : vector<8x8xf32>
    %c0_41 = arith.constant 0 : index
    %c0_42 = arith.constant 0 : index
    %94 = vector.load %arg6[%c0_41, %c0_42] : memref<8x8xf32, #tpu.memory_space<vmem>>, vector<8x8xf32>
    tpu.vector_store %arg6[%c0_41, %c0_42], %93 {strides = array<i32>} : memref<8x8xf32, #tpu.memory_space<vmem>>, vector<8x8xf32>,
    return
  }
}

</mosaic_0001>

<bundles_post_ra>
// kernel: lenet5_forward.1
= control target key start
LH: loop header
LB: loop body
LE: loop exit
PB: predicated region body
PF: predicated region fallthrough
CT: control target
= control target key end

     0   :  { %v2452_v0 = vmov 0   ;;  %v110_v34 = vlaneseq  ;;  %vm250_vm0 = vcmask 523264   ;;  %vm2454_vm1 = vmmov 0   ;;  %s3297_s0 = inlined_call_operand.vmem [shape: f32[128,1], index: 0, kind: input, shape index: {}]   ;;  %s3298_s2 = inlined_call_operand.vmem [shape: f32[192,64], index: 2, kind: input, shape index: {}]   ;;  %s3299_s1 = inlined_call_operand.vmem [shape: f32[8,128], index: 1, kind: input, shape index: {}]   ;;  %s3300_s3 = inlined_call_operand.vmem [shape: f32[768,84], index: 3, kind: input, shape index: {}]   ;;  %s3301_s4 = inlined_call_operand.vmem [shape: f32[84,8], index: 4, kind: input, shape index: {}]   ;;  %s3302_s5 = inlined_call_operand.vmem [shape: f32[1,8], index: 5, kind: input, shape index: {}]   ;;  %s3303_s6 = inlined_call_operand.vmem [shape: f32[8,8], index: 6, kind: output, shape index: {}]  }
   0x1   :  { %2396 = vset.pattern.permute.xlu1 %v2452_v0  ;;  %2395 = vset.pattern.permute.xlu0 %v2452_v0  ;;  %v26_v1 = vld [vmem:[%s3297_s0 + $0x18] sm:$0xff]  ;;  %v24_v2 = vld [vmem:[%s3297_s0 + $0x8] sm:$0xff]  ;;  %v27_v3 = vld [vmem:[%s3297_s0 + $0x20] sm:$0xff]  ;;  %vm1726_vm2 = vcmask 1043456   ;;  %vm1722_vm3 = vcmask 687104   ;;  %vm1800_vm4 = vcmask 64512  }
   0x2   :  { %57 = vperm.xlu1 %2396, %v26_v1   ;;  %47 = vperm.xlu0 %2395, %v24_v2   ;;  %v25_v4 = vld [vmem:[%s3297_s0 + $0x10] sm:$0xff]  ;;  %v28_v6 = vld [vmem:[%s3297_s0 + $0x28] sm:$0xff]  ;;  %v249_v7 = vld [vmem:[%s3298_s2 + $0x78] sm:$0xff]  ;;  %v2592_v35 = vshrl.u32 %v110_v34, 7 }
   0x3   :  { %v29_v5 = vld [vmem:[%s3297_s0 + $0x30] sm:$0xff]  ;;  %v31_v8 = vld [vmem:[%s3297_s0 + $0x40] sm:$0xff]  ;;  %v30_v9 = vld [vmem:[%s3297_s0 + $0x38] sm:$0xff]  ;;  %2037 = vmatprep.subr.mxu0 %v249_v7 }
   0x4   :  { %2038 = vmatpush3.msra.mxu0 %v249_v7  ;;  %v248_v10 = vld [vmem:[%s3298_s2 + $0x70] sm:$0xff]  ;;  %v247_v11 = vld [vmem:[%s3298_s2 + $0x68] sm:$0xff]  ;;  %v246_v14 = vld [vmem:[%s3298_s2 + $0x60] sm:$0xff]  ;;  %v135_v36 = vsub.s32 1, %v2592_v35  ;;  %v112_v38 = vsub.s32 0, %v2592_v35  ;;  %v172_v39 = vsub.s32 2, %v2592_v35 }
   0x5   :  { %2039 = vmatprep.subr.mxu0 %v248_v10  ;;  %v33_v12 = vld [vmem:[%s3297_s0 + $0x50] sm:$0xff]  ;;  %v32_v13 = vld [vmem:[%s3297_s0 + $0x48] sm:$0xff]  ;;  %v245_v15 = vld [vmem:[%s3298_s2 + $0x58] sm:$0xff]  ;;  %v204_v46 = vsub.s32 3, %v2592_v35 }
   0x6   :  { %62 = vperm.xlu1 %2396, %v27_v3   ;;  %52 = vperm.xlu0 %2395, %v25_v4   ;;  %v35_v16 = vld [vmem:[%s3297_s0 + $0x60] sm:$0xff]  ;;  %v34_v17 = vld [vmem:[%s3297_s0 + $0x58] sm:$0xff]  ;;  %v244_v18 = vld [vmem:[%s3298_s2 + $0x50] sm:$0xff] }
   0x7   :  { %2040 = vmatpush3.msra.mxu0 %v248_v10  ;;  %v36_v19 = vld [vmem:[%s3297_s0 + $0x68] sm:$0xff]  ;;  %v23_v20 = vld [vmem:[%s3297_s0] sm:$0xff]  ;;  %v37_v23 = vld [vmem:[%s3297_s0 + $0x70] sm:$0xff] }
   0x8   :  { %2041 = vmatprep.subr.mxu0 %v247_v11  ;;  %v243_v21 = vld [vmem:[%s3298_s2 + $0x48] sm:$0xff]  ;;  %v242_v22 = vld [vmem:[%s3298_s2 + $0x40] sm:$0xff]  ;;  %v38_v24 = vld [vmem:[%s3297_s0 + $0x78] sm:$0xff] }
   0x9   :  { %2042 = vmatpush3.msra.mxu0 %v247_v11  ;;  %v241_v25 = vld [vmem:[%s3298_s2 + $0x38] sm:$0xff]  ;;  %v240_v27 = vld [vmem:[%s3298_s2 + $0x30] sm:$0xff]  ;;  %v239_v28 = vld [vmem:[%s3298_s2 + $0x28] sm:$0xff] }
   0xa   :  { %72 = vperm.xlu1 %2396, %v29_v5   ;;  %67 = vperm.xlu0 %2395, %v28_v6   ;;  %v2568_v26 = vld [vmem:[%s3298_s2 + $0xb8] sm:$0xff]  ;;  %v238_v29 = vld [vmem:[%s3298_s2 + $0x20] sm:$0xff]  ;;  %v236_v31 = vld [vmem:[%s3298_s2 + $0x10] sm:$0xff] }
   0xb   :  { %2043 = vmatprep.subr.mxu0 %v246_v14  ;;  %2071 = vmatprep.subr.mxu1 %v241_v25  ;;  %v237_v30 = vld [vmem:[%s3298_s2 + $0x18] sm:$0xff]  ;;  %v235_v32 = vld [vmem:[%s3298_s2 + $0x8] sm:$0xff]  ;;  %v234_v33 = vld [vmem:[%s3298_s2] sm:$0xff] }
   0xc   :  { %2044 = vmatpush3.msra.mxu0 %v246_v14  ;;  %2072 = vmatpush3.msra.mxu1 %v241_v25  ;;  %v2598_v37 = vld [vmem:[%s3299_s1] sm:$0xff] }
   0xd   :  { %2045 = vmatprep.subr.mxu0 %v245_v15  ;;  %2073 = vmatprep.subr.mxu1 %v240_v27  ;;  %v2605_v42 = vrot.slane %v2598_v37, %v135_v36  ;;  %v2608_v43 = vrot.slane %v2598_v37, %v112_v38  ;;  %v2611_v44 = vrot.slane %v2598_v37, %v172_v39 }
   0xe   :  { %82 = vperm.xlu1 %2396, %v31_v8   ;;  %77 = vperm.xlu0 %2395, %v30_v9   ;;  %v2627_v55 = vrot.slane %v2598_v37, %v204_v46 }
   0xf   :  { %2046 = vmatpush3.msra.mxu0 %v245_v15  ;;  %2074 = vmatpush3.msra.mxu1 %v240_v27 }
  0x10   :  { %2047 = vmatprep.subr.mxu0 %v244_v18  ;;  %2075 = vmatprep.subr.mxu1 %v239_v28 }
  0x11   :  { %2048 = vmatpush3.msra.mxu0 %v244_v18  ;;  %2076 = vmatpush3.msra.mxu1 %v239_v28 }
  0x12   :  { %92 = vperm.xlu1 %2396, %v33_v12   ;;  %87 = vperm.xlu0 %2395, %v32_v13  }
  0x13   :  { %2049 = vmatprep.subr.mxu0 %v243_v21  ;;  %2077 = vmatprep.subr.mxu1 %v238_v29 }
  0x14   :  { %2050 = vmatpush3.msra.mxu0 %v243_v21  ;;  %2078 = vmatpush3.msra.mxu1 %v238_v29 }
  0x15   :  { %2051 = vmatprep.subr.mxu0 %v242_v22  ;;  %2079 = vmatprep.subr.mxu1 %v237_v30 }
  0x16   :  { %102 = vperm.xlu1 %2396, %v35_v16   ;;  %97 = vperm.xlu0 %2395, %v34_v17  }
  0x17   :  { %2052 = vmatpush3.msra.mxu0 %v242_v22  ;;  %2080 = vmatpush3.msra.mxu1 %v237_v30 }
  0x18   :  { %2105 = vmatprep.subr.mxu0 %v2568_v26  ;;  %2081 = vmatprep.subr.mxu1 %v236_v31 }
  0x19   :  { %2082 = vmatpush3.msra.mxu1 %v236_v31 }
  0x1a   :  { %107 = vperm.xlu0 %2395, %v36_v19   ;;  %42 = vperm.xlu1 %2396, %v23_v20  }
  0x1b   :  { %2083 = vmatprep.subr.mxu1 %v235_v32 }
  0x1c   :  { %2084 = vmatpush3.msra.mxu1 %v235_v32 }
  0x1d   :  { %2085 = vmatprep.subr.mxu1 %v234_v33 }
  0x1e   :  { %130 = vperm.xlu0 %2395, %v37_v23   ;;  %167 = vperm.xlu1 %2396, %v38_v24  }
  0x1f   :  { %2086 = vmatpush3.msra.mxu1 %v234_v33 }
  0x7d   :  { %v58_v40 = vpop.permute.xlu1 %57  ;;  %v2602_v41 = vpop.permute.xlu0 %47 }
  0x7e   :  { %v139_v45 = vmul.f32 %v2605_v42, %v58_v40  ;;  %v117_v49 = vmul.f32 %v2608_v43, %v58_v40  ;;  %v115_v52 = vmul.f32 %v2608_v43, %v2602_v41  ;;  %v175_v57 = vmul.f32 %v2611_v44, %v58_v40 }
  0x81   :  { %v63_v47 = vpop.permute.xlu1 %62  ;;  %v2615_v48 = vpop.permute.xlu0 %52 }
  0x82   :  { %v140_v50 = vmul.f32 %v2605_v42, %v63_v47  ;;  %v116_v51 = vmul.f32 %v2608_v43, %v2615_v48  ;;  %v138_v53 = vmul.f32 %v2605_v42, %v2615_v48  ;;  %v176_v54 = vmul.f32 %v2611_v44, %v63_v47 }
  0x83   :  { %v118_v61 = vmul.f32 %v2608_v43, %v63_v47 }
  0x84   :  { %v153_v56 = vadd.f32 %v139_v45, %v116_v51  ;;  %v152_v58 = vadd.f32 %v138_v53, %v115_v52  ;;  %v154_v62 = vadd.f32 %v140_v50, %v117_v49 }
  0x85   :  { %v73_v59 = vpop.permute.xlu1 %72  ;;  %v68_v60 = vpop.permute.xlu0 %67 }
  0x86   :  { %v190_v63 = vadd.f32 %v176_v54, %v153_v56  ;;  %v142_v0 = vmul.f32 %v2605_v42, %v73_v59  ;;  %v189_v1 = vadd.f32 %v175_v57, %v152_v58  ;;  %v119_v2 = vmul.f32 %v2608_v43, %v68_v60 }
  0x87   :  { %v141_v3 = vmul.f32 %v2605_v42, %v68_v60  ;;  %v177_v4 = vmul.f32 %v2611_v44, %v68_v60  ;;  %v178_v7 = vmul.f32 %v2611_v44, %v73_v59  ;;  %v120_v12 = vmul.f32 %v2608_v43, %v73_v59 }
  0x88   :  { %v208_v5 = vadd.f32 %v2627_v55, %v190_v63  ;;  %v207_v6 = vadd.f32 %v2627_v55, %v189_v1  ;;  %v156_v13 = vadd.f32 %v142_v0, %v119_v2  ;;  %v137_v57 = vmul.f32 %v2605_v42, %v2602_v41 }
  0x89   :  { %v155_v8 = vadd.f32 %v141_v3, %v118_v61  ;;  %v191_v9 = vadd.f32 %v177_v4, %v154_v62  ;;  %v83_v10 = vpop.permute.xlu1 %82  ;;  %v78_v11 = vpop.permute.xlu0 %77 }
  0x8a   :  { %2397 = vtanh.f32 %v208_v5  ;;  %v144_v16 = vmul.f32 %v2605_v42, %v83_v10  ;;  %v121_v17 = vmul.f32 %v2608_v43, %v78_v11  ;;  %v143_v18 = vmul.f32 %v2605_v42, %v78_v11 }
  0x8b   :  { %2399 = vtanh.f32 %v207_v6  ;;  %v192_v14 = vadd.f32 %v178_v7, %v155_v8  ;;  %v209_v15 = vadd.f32 %v2627_v55, %v191_v9  ;;  %v179_v19 = vmul.f32 %v2611_v44, %v78_v11 }
  0x8c   :  { %v122_v23 = vmul.f32 %v2608_v43, %v83_v10  ;;  %v180_v24 = vmul.f32 %v2611_v44, %v83_v10  ;;  %v157_v25 = vadd.f32 %v143_v18, %v120_v12  ;;  %v158_v31 = vadd.f32 %v144_v16, %v121_v17  ;;  %v546_v12 = vld [vmem:[%s3298_s2 + $0xb0] sm:$0xff]  ;;  %v545_v18 = vld [vmem:[%s3298_s2 + $0xa8] sm:$0xff] }
  0x8d   :  { %v210_v20 = vadd.f32 %v2627_v55, %v192_v14  ;;  %2401 = vtanh.f32 %v209_v15  ;;  %v93_v21 = vpop.permute.xlu1 %92  ;;  %v88_v22 = vpop.permute.xlu0 %87  ;;  %v193_v27 = vadd.f32 %v179_v19, %v156_v13  ;;  %v174_v8 = vmul.f32 %v2611_v44, %v2615_v48 }
  0x8e   :  { %v146_v28 = vmul.f32 %v2605_v42, %v93_v21  ;;  %v123_v29 = vmul.f32 %v2608_v43, %v88_v22  ;;  %v145_v30 = vmul.f32 %v2605_v42, %v88_v22  ;;  %v194_v32 = vadd.f32 %v180_v24, %v157_v25  ;;  %v543_v24 = vld [vmem:[%s3298_s2 + $0x98] sm:$0xff] }
  0x8f   :  { %2403 = vtanh.f32 %v210_v20  ;;  %v211_v33 = vadd.f32 %v2627_v55, %v193_v27  ;;  %v181_v34 = vmul.f32 %v2611_v44, %v88_v22  ;;  %v182_v36 = vmul.f32 %v2611_v44, %v93_v21  ;;  %v544_v22 = vld [vmem:[%s3298_s2 + $0xa0] sm:$0xff]  ;;  %v542_v27 = vld [vmem:[%s3298_s2 + $0x90] sm:$0xff] }
  0x90   :  { %v159_v38 = vadd.f32 %v145_v30, %v122_v23  ;;  %v212_v45 = vadd.f32 %v2627_v55, %v194_v32  ;;  %v124_v46 = vmul.f32 %v2608_v43, %v93_v21  ;;  %v160_v49 = vadd.f32 %v146_v28, %v123_v29  ;;  %v541_v29 = vld [vmem:[%s3298_s2 + $0x88] sm:$0xff] }
  0x91   :  { %v103_v39 = vpop.permute.xlu1 %102  ;;  %v98_v40 = vpop.permute.xlu0 %97  ;;  %2405 = vtanh.f32 %v211_v33  ;;  %v195_v47 = vadd.f32 %v181_v34, %v158_v31  ;;  %v540_v31 = vld [vmem:[%s3298_s2 + $0x80] sm:$0xff] }
  0x92   :  { %v196_v50 = vadd.f32 %v182_v36, %v159_v38  ;;  %v148_v51 = vmul.f32 %v2605_v42, %v103_v39  ;;  %v125_v52 = vmul.f32 %v2608_v43, %v98_v40  ;;  %2407 = vtanh.f32 %v212_v45 }
  0x93   :  { %v213_v53 = vadd.f32 %v2627_v55, %v195_v47  ;;  %v147_v54 = vmul.f32 %v2605_v42, %v98_v40  ;;  %v183_v56 = vmul.f32 %v2611_v44, %v98_v40  ;;  %v184_v59 = vmul.f32 %v2611_v44, %v103_v39 }
  0x94   :  { %v214_v58 = vadd.f32 %v2627_v55, %v196_v50  ;;  %v162_v63 = vadd.f32 %v148_v51, %v125_v52  ;;  %v126_v5 = vmul.f32 %v2608_v43, %v103_v39  ;;  %v2453_v47 = vmov 0.0   ;;  %v730_v50 = vld [vmem:[%s3300_s3 + $0x70] sm:$0xff]  ;;  %v729_v51 = vld [vmem:[%s3300_s3 + $0x68] sm:$0xff]  ;;  %v728_v52 = vld [vmem:[%s3300_s3 + $0x60] sm:$0xff] }
  0x95   :  { %v2664_v60 = vpop.permute.xlu0 %107  ;;  %v43_v61 = vpop.permute.xlu1 %42  ;;  %2409 = vtanh.f32 %v213_v53  ;;  %v161_v62 = vadd.f32 %v147_v54, %v124_v46  ;;  %v197_v0 = vadd.f32 %v183_v56, %v160_v49  ;;  %2139 = vmatprep.subr.mxu1 %v2453_v47  ;;  %v731_v49 = vld [vmem:[%s3300_s3 + $0x78] sm:$0xff]  ;;  %v884_v56 = vld [vmem:[%s3300_s3 + $0xb0] sm:$0xff] }
  0x96   :  { %2411 = vtanh.f32 %v214_v58  ;;  %v149_v2 = vmul.f32 %v2605_v42, %v2664_v60  ;;  %v185_v41 = vmul.f32 %v2611_v44, %v2664_v60  ;;  %v114_v3 = vmul.f32 %v2608_v43, %v43_v61  ;;  %v885_v53 = vld [vmem:[%s3300_s3 + $0xb8] sm:$0xff]  ;;  %v883_v58 = vld [vmem:[%s3300_s3 + $0xa8] sm:$0xff]  ;;  %v724_v61 = vld [vmem:[%s3300_s3 + $0x40] sm:$0xff] }
  0x97   :  { %v2666_v1 = vpop.eup %2397  ;;  %v198_v6 = vadd.f32 %v184_v59, %v161_v62  ;;  %v215_v7 = vadd.f32 %v2627_v55, %v197_v0  ;;  %v127_v38 = vmul.f32 %v2608_v43, %v2664_v60  ;;  %v727_v54 = vld [vmem:[%s3300_s3 + $0x58] sm:$0xff]  ;;  %v725_v59 = vld [vmem:[%s3300_s3 + $0x48] sm:$0xff]  ;;  %v882_v60 = vld [vmem:[%s3300_s3 + $0xa0] sm:$0xff] }
  0x98   :  { %v2673_v4 = vpop.eup %2399  ;;  %v199_v9 = vadd.f32 %v185_v41, %v162_v63  ;;  %v151_v10 = vadd.f32 %v137_v57, %v114_v3  ;;  %v163_v15 = vadd.f32 %v149_v2, %v126_v5  ;;  %v726_v57 = vld [vmem:[%s3300_s3 + $0x50] sm:$0xff]  ;;  %v881_v62 = vld [vmem:[%s3300_s3 + $0x98] sm:$0xff]  ;;  %v879_v0 = vld [vmem:[%s3300_s3 + $0x88] sm:$0xff] }
  0x99   :  { %2053 = vmatprep.mubr.msk.f32.mxu0 %vm250_vm0, %v2673_v4  ;;  %v131_v11 = vpop.permute.xlu0 %130  ;;  %v216_v14 = vadd.f32 %v2627_v55, %v198_v6  ;;  %2413 = vtanh.f32 %v215_v7  ;;  %v168_v39 = vpop.permute.xlu1 %167  ;;  %v880_v63 = vld [vmem:[%s3300_s3 + $0x90] sm:$0xff] }
  0x9a   :  { %v2684_v13 = vpop.eup %2401  ;;  %2054 = vmatmul.mubr.msk.f32.vlgmr.msra.gmra.mxu0 %vm250_vm0, %v2666_v1  ;;  %v186_v48 = vmul.f32 %v2611_v44, %v131_v11  ;;  %v217_v16 = vadd.f32 %v2627_v55, %v199_v9  ;;  %v188_v17 = vadd.f32 %v174_v8, %v151_v10  ;;  %v150_v33 = vmul.f32 %v2605_v42, %v131_v11 }
  0x9b   :  { %2056 = vmatprep.mubr.msk.f32.mxu0 %vm250_vm0, %v2684_v13  ;;  %2106 = vmatpush3.msra.mxu0 %v2568_v26  ;;  %2415 = vtanh.f32 %v216_v14  ;;  %v187_v42 = vmul.f32 %v2611_v44, %v168_v39  ;;  %v690_v11 = vsub.s32 4, %v2592_v35 }
  0x9c   :  { %v2404_v19 = vpop.eup %2403  ;;  %v200_v20 = vadd.f32 %v186_v48, %v163_v15  ;;  %2107 = vmatprep.subr.mxu0 %v546_v12  ;;  %2417 = vtanh.f32 %v217_v16  ;;  %v206_v21 = vadd.f32 %v2627_v55, %v188_v17  ;;  %v164_v45 = vadd.f32 %v150_v33, %v127_v38 }
  0x9d   :  { %2108 = vmatpush3.msra.mxu0 %v546_v12  ;;  %v2837_v16 = vrot.slane %v2598_v37, %v690_v11 }
  0x9e   :  { %v218_v23 = vadd.f32 %v2627_v55, %v200_v20  ;;  %2057 = vmatmul.mubr.msk.f32.gmra.mxu0 %vm250_vm0, %v2404_v19  ;;  %2109 = vmatprep.subr.mxu0 %v545_v18  ;;  %v2406_v26 = vpop.eup %2405  ;;  %2419 = vtanh.f32 %v206_v21  ;;  %v201_v43 = vadd.f32 %v187_v42, %v164_v45 }
  0x9f   :  { %2110 = vmatpush3.msra.mxu0 %v545_v18  ;;  %2059 = vmatprep.mubr.msk.f32.mxu0 %vm250_vm0, %v2406_v26  ;;  %v2408_v25 = vpop.eup %2407 }
  0xa0   :  { %2421 = vtanh.f32 %v218_v23  ;;  %2111 = vmatprep.subr.mxu0 %v544_v22  ;;  %v219_v44 = vadd.f32 %v2627_v55, %v201_v43 }
  0xa1   :  { %2112 = vmatpush3.msra.mxu0 %v544_v22 }
  0xa2   :  { %2060 = vmatmul.mubr.msk.f32.gmra.mxu0 %vm250_vm0, %v2408_v25  ;;  %2113 = vmatprep.subr.mxu0 %v543_v24  ;;  %v2410_v28 = vpop.eup %2409  ;;  %2423 = vtanh.f32 %v219_v44 }
  0xa3   :  { %2114 = vmatpush3.msra.mxu0 %v543_v24  ;;  %v2412_v30 = vpop.eup %2411  ;;  %2062 = vmatprep.mubr.msk.f32.mxu0 %vm250_vm0, %v2410_v28 }
  0xa4   :  { %2115 = vmatprep.subr.mxu0 %v542_v27 }
  0xa5   :  { %2116 = vmatpush3.msra.mxu0 %v542_v27 }
  0xa6   :  { %2063 = vmatmul.mubr.msk.f32.gmra.mxu0 %vm250_vm0, %v2412_v30  ;;  %2117 = vmatprep.subr.mxu0 %v541_v29  ;;  %v2414_v32 = vpop.eup %2413 }
  0xa7   :  { %2118 = vmatpush3.msra.mxu0 %v541_v29  ;;  %2065 = vmatprep.mubr.msk.f32.mxu0 %vm250_vm0, %v2414_v32 }
  0xa8   :  { %2119 = vmatprep.subr.mxu0 %v540_v31  ;;  %v2416_v34 = vpop.eup %2415 }
  0xa9   :  { %2120 = vmatpush3.msra.mxu0 %v540_v31  ;;  %v2418_v36 = vpop.eup %2417 }
  0xaa   :  { %2066 = vmatmul.mubr.msk.f32.gmra.mxu0 %vm250_vm0, %v2416_v34  ;;  %2177 = vmatprep.subr.mxu0 %v2453_v47 }
  0xab   :  { %2068 = vmatprep.mubr.msk.f32.mxu0 %vm250_vm0, %v2418_v36  ;;  %v2420_v40 = vpop.eup %2419 }
  0xac   :  { %2087 = vmatprep.mubr.msk.f32.mxu1 %vm250_vm0, %v2420_v40 }
  0xad   :  { %v2422_v46 = vpop.eup %2421  ;;  %2088 = vmatmul.mubr.msk.f32.vlgmr.msra.gmra.mxu1 %vm250_vm0, %v2673_v4 }
  0xae   :  { %2069 = vmatmul.mubr.msk.f32.gmra.mxu0 %vm250_vm0, %v2422_v46  ;;  %2090 = vmatprep.mubr.msk.f32.mxu1 %vm250_vm0, %v2666_v1 }
  0xaf   :  { %2121 = vmatprep.mubr.msk.f32.mxu0 %vm250_vm0, %v2666_v1  ;;  %v2424_v55 = vpop.eup %2423  ;;  %2140 = vmatpush3.msra.mxu1 %v731_v49  ;;  %v878_v1 = vld [vmem:[%s3300_s3 + $0x80] sm:$0xff] }
  0xb0   :  { %2141 = vmatprep.subr.mxu1 %v2453_v47 }
  0xb1   :  { %2091 = vmatmul.mubr.msk.f32.gmra.mxu1 %vm250_vm0, %v2684_v13 }
  0xb2   :  { %2122 = vmatmul.mubr.msk.f32.vlgmr.msra.gmra.mxu0 %vm250_vm0, %v2684_v13  ;;  %2093 = vmatprep.mubr.msk.f32.mxu1 %vm250_vm0, %v2404_v19 }
  0xb3   :  { %2124 = vmatprep.mubr.msk.f32.mxu0 %vm250_vm0, %v2404_v19  ;;  %2142 = vmatpush3.msra.mxu1 %v730_v50 }
  0xb4   :  { %2143 = vmatprep.subr.mxu1 %v2453_v47  ;;  %2178 = vmatpush3.msra.mxu0 %v885_v53 }
  0xb5   :  { %2094 = vmatmul.mubr.msk.f32.gmra.mxu1 %vm250_vm0, %v2406_v26  ;;  %2179 = vmatprep.subr.mxu0 %v2453_v47 }
  0xb6   :  { %2125 = vmatmul.mubr.msk.f32.gmra.mxu0 %vm250_vm0, %v2406_v26  ;;  %2096 = vmatprep.mubr.msk.f32.mxu1 %vm250_vm0, %v2408_v25 }
  0xb7   :  { %2127 = vmatprep.mubr.msk.f32.mxu0 %vm250_vm0, %v2408_v25  ;;  %2144 = vmatpush3.msra.mxu1 %v729_v51  ;;  %v723_v51 = vld [vmem:[%s3300_s3 + $0x38] sm:$0xff] }
  0xb8   :  { %2145 = vmatprep.subr.mxu1 %v2453_v47  ;;  %2180 = vmatpush3.msra.mxu0 %v884_v56 }
  0xb9   :  { %2097 = vmatmul.mubr.msk.f32.gmra.mxu1 %vm250_vm0, %v2410_v28  ;;  %2181 = vmatprep.subr.mxu0 %v2453_v47 }
  0xba   :  { %2128 = vmatmul.mubr.msk.f32.gmra.mxu0 %vm250_vm0, %v2410_v28  ;;  %2099 = vmatprep.mubr.msk.f32.mxu1 %vm250_vm0, %v2412_v30 }
  0xbb   :  { %2130 = vmatprep.mubr.msk.f32.mxu0 %vm250_vm0, %v2412_v30  ;;  %2146 = vmatpush3.msra.mxu1 %v728_v52 }
  0xbc   :  { %2147 = vmatprep.subr.mxu1 %v2453_v47  ;;  %2182 = vmatpush3.msra.mxu0 %v883_v58 }
  0xbd   :  { %2100 = vmatmul.mubr.msk.f32.gmra.mxu1 %vm250_vm0, %v2414_v32  ;;  %2183 = vmatprep.subr.mxu0 %v2453_v47 }
  0xbe   :  { %2131 = vmatmul.mubr.msk.f32.gmra.mxu0 %vm250_vm0, %v2414_v32  ;;  %2102 = vmatprep.mubr.msk.f32.mxu1 %vm250_vm0, %v2416_v34 }
  0xbf   :  { %2133 = vmatprep.mubr.msk.f32.mxu0 %vm250_vm0, %v2416_v34  ;;  %2148 = vmatpush3.msra.mxu1 %v727_v54 }
  0xc0   :  { %2149 = vmatprep.subr.mxu1 %v2453_v47  ;;  %2184 = vmatpush3.msra.mxu0 %v882_v60 }
  0xc1   :  { %2103 = vmatmul.mubr.msk.f32.gmra.mxu1 %vm250_vm0, %v2418_v36  ;;  %2185 = vmatprep.subr.mxu0 %v2453_v47 }
  0xc2   :  { %2134 = vmatmul.mubr.msk.f32.gmra.mxu0 %vm250_vm0, %v2418_v36  ;;  %2150 = vmatpush3.msra.mxu1 %v726_v57 }
  0xc3   :  { %2136 = vmatprep.mubr.msk.f32.mxu0 %vm250_vm0, %v2422_v46  ;;  %2151 = vmatprep.subr.mxu1 %v2453_v47 }
  0xc4   :  { %2152 = vmatpush3.msra.mxu1 %v725_v59  ;;  %2186 = vmatpush3.msra.mxu0 %v881_v62  ;;  %v722_v59 = vld [vmem:[%s3300_s3 + $0x30] sm:$0xff] }
  0xc5   :  { %2153 = vmatprep.subr.mxu1 %v2453_v47  ;;  %2155 = vmatprep.mubr.msk.f32.mxu1 %vm2454_vm1, %v2453_v47 }
  0xc6   :  { %2137 = vmatmul.mubr.msk.f32.gmra.mxu0 %vm250_vm0, %v2424_v55  ;;  %2154 = vmatpush3.msra.mxu1 %v724_v61 }
  0xc7   :  { %2158 = vmatprep.subr.mxu1 %v2453_v47  ;;  %2187 = vmatprep.subr.mxu0 %v2453_v47 }
  0xc8   :  { %2193 = vmatprep.mubr.msk.f32.mxu0 %vm2454_vm1, %v2453_v47  ;;  %2188 = vmatpush3.msra.mxu0 %v880_v63 }
  0xc9   :  { %2189 = vmatprep.subr.mxu0 %v2453_v47 }
  0xca   :  { %2190 = vmatpush3.msra.mxu0 %v879_v0  ;;  %v721_v0 = vld [vmem:[%s3300_s3 + $0x28] sm:$0xff] }
  0xcb   :  { %2191 = vmatprep.subr.mxu0 %v2453_v47 }
  0xcc   :  { %2192 = vmatpush3.msra.mxu0 %v878_v1 }
  0xcd   :  { %2215 = vmatprep.subr.mxu0 %v2453_v47 }
 0x15a   :  { %v2055_v2 = vpop.f32.mrf.mxu0 }
 0x15c   :  { %v353_v41 = vpop.f32.mrf.mxu0 }
 0x15e   :  { %v2827_v3 = vpop.f32.mrf.mxu0 }
 0x160   :  { %v363_v4 = vpop.f32.mrf.mxu0 }
 0x162   :  { %v2829_v5 = vpop.f32.mrf.mxu0 }
 0x164   :  { %v373_v6 = vpop.f32.mrf.mxu0 }
 0x166   :  { %v2064_v7 = vpop.f32.mrf.mxu0 }
 0x168   :  { %v2831_v8 = vpop.f32.mrf.mxu0 }
 0x16a   :  { %v2067_v9 = vpop.f32.mrf.mxu0 }
 0x16c   :  { %v2833_v10 = vpop.f32.mrf.mxu0 }
 0x16d   :  { %v2089_v12 = vpop.f32.mrf.mxu1 }
 0x16e   :  { %v2070_v13 = vpop.f32.mrf.mxu0  ;;  %v487_v48 = vadd.f32 %v2089_v12, %v2055_v2  ;;  %v719_v12 = vld [vmem:[%s3300_s3 + $0x18] sm:$0xff] }
 0x16f   :  { %v481_v14 = vpop.f32.mrf.mxu1 }
 0x170   :  { %v403_v15 = vpop.f32.mrf.mxu0  ;;  %v482_v33 = vadd.f32 %v481_v14, %v353_v41  ;;  %v718_v14 = vld [vmem:[%s3300_s3 + $0x10] sm:$0xff] }
 0x171   :  { %v2839_v17 = vpop.f32.mrf.mxu1 }
 0x172   :  { %v2123_v18 = vpop.f32.mrf.mxu0 }
 0x173   :  { %v677_v19 = vadd.f32 %v2123_v18, %v487_v48  ;;  %v491_v20 = vpop.f32.mrf.mxu1  ;;  %v497_v48 = vadd.f32 %v2839_v17, %v2827_v3  ;;  %v717_v18 = vld [vmem:[%s3300_s3 + $0x8] sm:$0xff]  ;;  %v716_v3 = vld [vmem:[%s3300_s3] sm:$0xff]  ;;  %v1045_v17 = vld [vmem:[%s3300_s3 + $0x118] sm:$0xff] }
 0x174   :  { %v617_v21 = vpop.f32.mrf.mxu0  ;;  %v492_v24 = vadd.f32 %v491_v20, %v363_v4  ;;  %v720_v4 = vld [vmem:[%s3300_s3 + $0x20] sm:$0xff] }
 0x175   :  { %v693_v22 = vadd.f32 %v2837_v16, %v677_v19  ;;  %v2842_v23 = vpop.f32.mrf.mxu1  ;;  %v676_v39 = vadd.f32 %v617_v21, %v482_v33  ;;  %v1046_v19 = vld [vmem:[%s3300_s3 + $0x120] sm:$0xff]  ;;  %v967_v21 = vld [vmem:[%s3300_s3 + $0xf8] sm:$0xff] }
 0x176   :  { %v2844_v26 = vpop.f32.mrf.mxu0  ;;  %v1213_v33 = vld [vmem:[%s3300_s3 + $0x1b8] sm:$0xff] }
 0x177   :  { %2425 = vtanh.f32 %v693_v22  ;;  %v501_v25 = vpop.f32.mrf.mxu1  ;;  %v692_v49 = vadd.f32 %v2837_v16, %v676_v39  ;;  %v679_v20 = vadd.f32 %v2844_v26, %v497_v48  ;;  %v1044_v26 = vld [vmem:[%s3300_s3 + $0x110] sm:$0xff]  ;;  %v1370_v48 = vld [vmem:[%s3300_s3 + $0x200] sm:$0xff] }
 0x178   :  { %v627_v27 = vpop.f32.mrf.mxu0  ;;  %v502_v53 = vadd.f32 %v501_v25, %v373_v6  ;;  %v1049_v6 = vld [vmem:[%s3300_s3 + $0x138] sm:$0xff]  ;;  %v966_v25 = vld [vmem:[%s3300_s3 + $0xf0] sm:$0xff] }
 0x179   :  { %v678_v28 = vadd.f32 %v627_v27, %v492_v24  ;;  %v2098_v29 = vpop.f32.mrf.mxu1  ;;  %v695_v24 = vadd.f32 %v2837_v16, %v679_v20  ;;  %v962_v39 = vld [vmem:[%s3300_s3 + $0xd0] sm:$0xff]  ;;  %v1541_v20 = vld [vmem:[%s3300_s3 + $0x2b8] sm:$0xff] }
 0x17a   :  { %v2846_v37 = vpop.f32.mrf.mxu0  ;;  %v517_v34 = vadd.f32 %v2098_v29, %v2064_v7  ;;  %v965_v29 = vld [vmem:[%s3300_s3 + $0xe8] sm:$0xff] }
 0x17b   :  { %v694_v30 = vadd.f32 %v2837_v16, %v678_v28  ;;  %v2849_v31 = vpop.f32.mrf.mxu1  ;;  %v1043_v28 = vld [vmem:[%s3300_s3 + $0x108] sm:$0xff] }
 0x17c   :  { %v637_v32 = vpop.f32.mrf.mxu0  ;;  %v512_v27 = vadd.f32 %v2849_v31, %v2831_v8  ;;  %v1042_v8 = vld [vmem:[%s3300_s3 + $0x100] sm:$0xff] }
 0x17d   :  { %2427 = vtanh.f32 %v694_v30  ;;  %v2101_v36 = vpop.f32.mrf.mxu1  ;;  %v680_v60 = vadd.f32 %v637_v32, %v502_v53  ;;  %v964_v31 = vld [vmem:[%s3300_s3 + $0xe0] sm:$0xff] }
 0x17e   :  { %v2132_v38 = vpop.f32.mrf.mxu0  ;;  %v527_v42 = vadd.f32 %v2101_v36, %v2067_v9  ;;  %2429 = vtanh.f32 %v692_v49  ;;  %v963_v36 = vld [vmem:[%s3300_s3 + $0xd8] sm:$0xff] }
 0x17f   :  { %v683_v40 = vadd.f32 %v2132_v38, %v517_v34  ;;  %v2851_v45 = vpop.f32.mrf.mxu1  ;;  %v696_v9 = vadd.f32 %v2837_v16, %v680_v60  ;;  %v1212_v38 = vld [vmem:[%s3300_s3 + $0x1b0] sm:$0xff] }
 0x180   :  { %v2853_v46 = vpop.f32.mrf.mxu0  ;;  %v522_v53 = vadd.f32 %v2851_v45, %v2833_v10  ;;  %v1206_v10 = vld [vmem:[%s3300_s3 + $0x180] sm:$0xff] }
 0x181   :  { %v2856_v43 = vadd.f32 %v2837_v16, %v683_v40  ;;  %v2104_v44 = vpop.f32.mrf.mxu1  ;;  %2431 = vtanh.f32 %v696_v9  ;;  %v682_v30 = vadd.f32 %v2853_v46, %v512_v27  ;;  %v1211_v40 = vld [vmem:[%s3300_s3 + $0x1a8] sm:$0xff]  ;;  %v1128_v45 = vld [vmem:[%s3300_s3 + $0x160] sm:$0xff] }
 0x182   :  { %v2135_v55 = vpop.f32.mrf.mxu0  ;;  %v537_v57 = vadd.f32 %v2104_v44, %v2070_v13  ;;  %v1048_v13 = vld [vmem:[%s3300_s3 + $0x130] sm:$0xff]  ;;  %2433 = vtanh.f32 %v695_v24  ;;  %v961_v46 = vld [vmem:[%s3300_s3 + $0xc8] sm:$0xff]  ;;  %v1210_v44 = vld [vmem:[%s3300_s3 + $0x1a0] sm:$0xff] }
 0x183   :  { %v685_v50 = vadd.f32 %v2135_v55, %v527_v42  ;;  %v531_v54 = vpop.f32.mrf.mxu1  ;;  %v698_v34 = vadd.f32 %v2837_v16, %v682_v30  ;;  %v507_v42 = vadd.f32 %v2842_v23, %v2829_v5  ;;  %v960_v55 = vld [vmem:[%s3300_s3 + $0xc0] sm:$0xff]  ;;  %v1209_v5 = vld [vmem:[%s3300_s3 + $0x198] sm:$0xff]  ;;  %v1535_v30 = vld [vmem:[%s3300_s3 + $0x288] sm:$0xff] }
 0x184   :  { %v2426_v52 = vpop.eup %2425  ;;  %v2862_v56 = vpop.f32.mrf.mxu0  ;;  %v532_v62 = vadd.f32 %v531_v54, %v403_v15  ;;  %v1047_v15 = vld [vmem:[%s3300_s3 + $0x128] sm:$0xff]  ;;  %v1131_v23 = vld [vmem:[%s3300_s3 + $0x178] sm:$0xff] }
 0x185   :  { %v2865_v58 = vadd.f32 %v2837_v16, %v685_v50  ;;  %2156 = vmatmul.mubr.msk.f32.vlgmr.msra.gmra.mxu1 %vm250_vm0, %v2426_v52  ;;  %2435 = vtanh.f32 %v698_v34  ;;  %v681_v49 = vadd.f32 %v2846_v37, %v507_v42  ;;  %v1208_v37 = vld [vmem:[%s3300_s3 + $0x190] sm:$0xff]  ;;  %v1207_v54 = vld [vmem:[%s3300_s3 + $0x188] sm:$0xff]  ;;  %v1537_v24 = vld [vmem:[%s3300_s3 + $0x298] sm:$0xff] }
 0x186   :  { %2159 = vmatpush3.msra.mxu1 %v723_v51  ;;  %v2138_v61 = vpop.f32.mrf.mxu0  ;;  %2174 = vmatprep.mubr.msk.f32.mxu1 %vm2454_vm1, %v2453_v47  ;;  %v1130_v52 = vld [vmem:[%s3300_s3 + $0x170] sm:$0xff]  ;;  %v1621_v42 = vld [vmem:[%s3300_s3 + $0x2e8] sm:$0xff] }
 0x187   :  { %v687_v63 = vadd.f32 %v2138_v61, %v537_v57  ;;  %2160 = vmatprep.subr.mxu1 %v2453_v47  ;;  %v697_v51 = vadd.f32 %v2837_v16, %v681_v49  ;;  %v1129_v57 = vld [vmem:[%s3300_s3 + $0x168] sm:$0xff]  ;;  %v1454_v34 = vld [vmem:[%s3300_s3 + $0x250] sm:$0xff] }
 0x188   :  { %2161 = vmatpush3.msra.mxu1 %v722_v59  ;;  %v667_v1 = vpop.f32.mrf.mxu0  ;;  %v684_v59 = vadd.f32 %v2862_v56, %v522_v53  ;;  %v1377_v56 = vld [vmem:[%s3300_s3 + $0x238] sm:$0xff]  ;;  %v1617_v49 = vld [vmem:[%s3300_s3 + $0x2c8] sm:$0xff]  ;;  %v1710_v53 = vld [vmem:[%s3301_s4 + $0x30] sm:$0xff] }
 0x189   :  { %v2878_v2 = vadd.f32 %v2837_v16, %v687_v63  ;;  %v686_v41 = vadd.f32 %v667_v1, %v532_v62  ;;  %2162 = vmatprep.subr.mxu1 %v2453_v47  ;;  %2437 = vtanh.f32 %v697_v51  ;;  %v1127_v62 = vld [vmem:[%s3300_s3 + $0x158] sm:$0xff]  ;;  %v1376_v63 = vld [vmem:[%s3300_s3 + $0x230] sm:$0xff]  ;;  %v1125_v1 = vld [vmem:[%s3300_s3 + $0x148] sm:$0xff] }
 0x18a   :  { %v2428_v7 = vpop.eup %2427  ;;  %2163 = vmatpush3.msra.mxu1 %v721_v0  ;;  %v700_v61 = vadd.f32 %v2837_v16, %v684_v59  ;;  %v1375_v0 = vld [vmem:[%s3300_s3 + $0x228] sm:$0xff]  ;;  %v1712_v51 = vld [vmem:[%s3301_s4 + $0x40] sm:$0xff]  ;;  %v1707_v59 = vld [vmem:[%s3301_s4 + $0x18] sm:$0xff] }
 0x18b   :  { %v2889_v11 = vadd.f32 %v2837_v16, %v686_v41  ;;  %2164 = vmatprep.subr.mxu1 %v2453_v47  ;;  %2194 = vmatmul.mubr.msk.f32.vlgmr.msra.gmra.mxu0 %vm250_vm0, %v2428_v7  ;;  %v2430_v22 = vpop.eup %2429  ;;  %v1126_v16 = vld [vmem:[%s3300_s3 + $0x150] sm:$0xff]  ;;  %v1374_v41 = vld [vmem:[%s3300_s3 + $0x220] sm:$0xff]  ;;  %v1295_v7 = vld [vmem:[%s3300_s3 + $0x1f8] sm:$0xff] }
 0x18c   :  { %2165 = vmatpush3.msra.mxu1 %v720_v4  ;;  %2216 = vmatpush3.msra.mxu0 %v1049_v6  ;;  %2439 = vtanh.f32 %v700_v61  ;;  %v1124_v4 = vld [vmem:[%s3300_s3 + $0x140] sm:$0xff]  ;;  %v1373_v6 = vld [vmem:[%s3300_s3 + $0x218] sm:$0xff] }
 0x18d   :  { %2166 = vmatprep.subr.mxu1 %v2453_v47  ;;  %2217 = vmatprep.subr.mxu0 %v2453_v47  ;;  %2441 = vtanh.f32 %v2856_v43  ;;  %v1291_v43 = vld [vmem:[%s3300_s3 + $0x1d8] sm:$0xff] }
 0x18e   :  { %2167 = vmatpush3.msra.mxu1 %v719_v12  ;;  %2218 = vmatpush3.msra.mxu0 %v1048_v13  ;;  %v2432_v32 = vpop.eup %2431  ;;  %v1372_v12 = vld [vmem:[%s3300_s3 + $0x210] sm:$0xff]  ;;  %2443 = vtanh.f32 %v2889_v11  ;;  %v1288_v11 = vld [vmem:[%s3300_s3 + $0x1c0] sm:$0xff] }
 0x18f   :  { %2168 = vmatprep.subr.mxu1 %v2453_v47  ;;  %2219 = vmatprep.subr.mxu0 %v2453_v47  ;;  %v2434_v50 = vpop.eup %2433  ;;  %v1294_v13 = vld [vmem:[%s3300_s3 + $0x1f0] sm:$0xff]  ;;  %2445 = vtanh.f32 %v2865_v58  ;;  %v1455_v58 = vld [vmem:[%s3300_s3 + $0x258] sm:$0xff] }
 0x190   :  { %2169 = vmatpush3.msra.mxu1 %v718_v14  ;;  %2220 = vmatpush3.msra.mxu0 %v1047_v15  ;;  %v1371_v14 = vld [vmem:[%s3300_s3 + $0x208] sm:$0xff]  ;;  %2447 = vtanh.f32 %v2878_v2  ;;  %v1619_v2 = vld [vmem:[%s3300_s3 + $0x2d8] sm:$0xff] }
 0x191   :  { %2170 = vmatprep.subr.mxu1 %v2453_v47  ;;  %2221 = vmatprep.subr.mxu0 %v2453_v47  ;;  %v1293_v15 = vld [vmem:[%s3300_s3 + $0x1e8] sm:$0xff] }
 0x192   :  { %2171 = vmatpush3.msra.mxu1 %v717_v18  ;;  %2222 = vmatpush3.msra.mxu0 %v1046_v19  ;;  %v2436_v60 = vpop.eup %2435  ;;  %v1292_v18 = vld [vmem:[%s3300_s3 + $0x1e0] sm:$0xff] }
 0x193   :  { %2172 = vmatprep.subr.mxu1 %v2453_v47  ;;  %2223 = vmatprep.subr.mxu0 %v2453_v47 }
 0x194   :  { %2173 = vmatpush3.msra.mxu1 %v716_v3  ;;  %2224 = vmatpush3.msra.mxu0 %v1045_v17  ;;  %v1540_v3 = vld [vmem:[%s3300_s3 + $0x2b0] sm:$0xff] }
 0x195   :  { %2175 = vmatmul.mubr.msk.f32.vlgmr.msra.gmra.mxu1 %vm250_vm0, %v2430_v22  ;;  %2196 = vmatprep.subr.mxu1 %v2453_v47  ;;  %v1290_v17 = vld [vmem:[%s3300_s3 + $0x1d0] sm:$0xff]  ;;  %v1289_v22 = vld [vmem:[%s3300_s3 + $0x1c8] sm:$0xff] }
 0x196   :  { %2225 = vmatprep.subr.mxu0 %v2453_v47  ;;  %2197 = vmatpush3.msra.mxu1 %v967_v21  ;;  %v2438_v9 = vpop.eup %2437  ;;  %v1539_v21 = vld [vmem:[%s3300_s3 + $0x2a8] sm:$0xff] }
 0x197   :  { %2226 = vmatpush3.msra.mxu0 %v1044_v26  ;;  %2198 = vmatprep.subr.mxu1 %v2453_v47  ;;  %v1538_v26 = vld [vmem:[%s3300_s3 + $0x2a0] sm:$0xff] }
 0x198   :  { %2227 = vmatprep.subr.mxu0 %v2453_v47  ;;  %2199 = vmatpush3.msra.mxu1 %v966_v25  ;;  %v1459_v25 = vld [vmem:[%s3300_s3 + $0x278] sm:$0xff] }
 0x199   :  { %2228 = vmatpush3.msra.mxu0 %v1043_v28  ;;  %2200 = vmatprep.subr.mxu1 %v2453_v47  ;;  %v2440_v19 = vpop.eup %2439  ;;  %v1536_v28 = vld [vmem:[%s3300_s3 + $0x290] sm:$0xff] }
 0x19a   :  { %2229 = vmatprep.subr.mxu0 %v2453_v47  ;;  %2201 = vmatpush3.msra.mxu1 %v965_v29  ;;  %v2442_v27 = vpop.eup %2441  ;;  %v1458_v29 = vld [vmem:[%s3300_s3 + $0x270] sm:$0xff] }
 0x19b   :  { %2230 = vmatpush3.msra.mxu0 %v1042_v8  ;;  %2231 = vmatprep.mubr.msk.f32.mxu0 %vm2454_vm1, %v2453_v47  ;;  %v1457_v8 = vld [vmem:[%s3300_s3 + $0x268] sm:$0xff] }
 0x19c   :  { %2202 = vmatprep.subr.mxu1 %v2453_v47  ;;  %2232 = vmatmul.mubr.msk.f32.vlgmr.msra.gmra.mxu0 %vm250_vm0, %v2432_v32  ;;  %v1456_v32 = vld [vmem:[%s3300_s3 + $0x260] sm:$0xff] }
 0x19d   :  { %2253 = vmatprep.subr.mxu0 %v2453_v47  ;;  %2203 = vmatpush3.msra.mxu1 %v964_v31  ;;  %v1534_v31 = vld [vmem:[%s3300_s3 + $0x280] sm:$0xff] }
 0x19e   :  { %2254 = vmatpush3.msra.mxu0 %v1213_v33  ;;  %2204 = vmatprep.subr.mxu1 %v2453_v47  ;;  %v2444_v33 = vpop.eup %2443 }
 0x19f   :  { %2255 = vmatprep.subr.mxu0 %v2453_v47  ;;  %2205 = vmatpush3.msra.mxu1 %v963_v36  ;;  %v1453_v36 = vld [vmem:[%s3300_s3 + $0x248] sm:$0xff] }
 0x1a0   :  { %2256 = vmatpush3.msra.mxu0 %v1212_v38  ;;  %2206 = vmatprep.subr.mxu1 %v2453_v47  ;;  %v1452_v38 = vld [vmem:[%s3300_s3 + $0x240] sm:$0xff] }
 0x1a1   :  { %2257 = vmatprep.subr.mxu0 %v2453_v47  ;;  %2207 = vmatpush3.msra.mxu1 %v962_v39  ;;  %v1623_v39 = vld [vmem:[%s3300_s3 + $0x2f8] sm:$0xff] }
 0x1a2   :  { %2258 = vmatpush3.msra.mxu0 %v1211_v40  ;;  %2208 = vmatprep.subr.mxu1 %v2453_v47  ;;  %v2446_v40 = vpop.eup %2445 }
 0x1a3   :  { %2259 = vmatprep.subr.mxu0 %v2453_v47  ;;  %2209 = vmatpush3.msra.mxu1 %v961_v46  ;;  %v1622_v46 = vld [vmem:[%s3300_s3 + $0x2f0] sm:$0xff] }
 0x1a4   :  { %2260 = vmatpush3.msra.mxu0 %v1210_v44  ;;  %2210 = vmatprep.subr.mxu1 %v2453_v47  ;;  %v1620_v44 = vld [vmem:[%s3300_s3 + $0x2e0] sm:$0xff] }
 0x1a5   :  { %2261 = vmatprep.subr.mxu0 %v2453_v47  ;;  %2211 = vmatpush3.msra.mxu1 %v960_v55  ;;  %v1618_v55 = vld [vmem:[%s3300_s3 + $0x2d0] sm:$0xff] }
 0x1a6   :  { %2212 = vmatprep.mubr.msk.f32.mxu1 %vm2454_vm1, %v2453_v47  ;;  %2262 = vmatpush3.msra.mxu0 %v1209_v5  ;;  %v1616_v5 = vld [vmem:[%s3300_s3 + $0x2c0] sm:$0xff] }
 0x1a7   :  { %2213 = vmatmul.mubr.msk.f32.vlgmr.msra.gmra.mxu1 %vm250_vm0, %v2434_v50  ;;  %2234 = vmatprep.subr.mxu1 %v2453_v47  ;;  %v1714_v50 = vld [vmem:[%s3301_s4 + $0x50] sm:$0xf] }
 0x1a8   :  { %2263 = vmatprep.subr.mxu0 %v2453_v47  ;;  %2235 = vmatpush3.msra.mxu1 %v1131_v23  ;;  %v2448_v23 = vpop.eup %2447 }
 0x1a9   :  { %2264 = vmatpush3.msra.mxu0 %v1208_v37  ;;  %2236 = vmatprep.subr.mxu1 %v2453_v47  ;;  %v1713_v37 = vld [vmem:[%s3301_s4 + $0x48] sm:$0xff] }
 0x1aa   :  { %2265 = vmatprep.subr.mxu0 %v2453_v47  ;;  %2237 = vmatpush3.msra.mxu1 %v1130_v52  ;;  %v1711_v52 = vld [vmem:[%s3301_s4 + $0x38] sm:$0xff] }
 0x1ab   :  { %2266 = vmatpush3.msra.mxu0 %v1207_v54  ;;  %2238 = vmatprep.subr.mxu1 %v2453_v47  ;;  %v1709_v54 = vld [vmem:[%s3301_s4 + $0x28] sm:$0xff] }
 0x1ac   :  { %2267 = vmatprep.subr.mxu0 %v2453_v47  ;;  %2239 = vmatpush3.msra.mxu1 %v1129_v57  ;;  %v1708_v57 = vld [vmem:[%s3301_s4 + $0x20] sm:$0xff] }
 0x1ad   :  { %2268 = vmatpush3.msra.mxu0 %v1206_v10  ;;  %2269 = vmatprep.mubr.msk.f32.mxu0 %vm2454_vm1, %v2453_v47  ;;  %v1706_v10 = vld [vmem:[%s3301_s4 + $0x10] sm:$0xff] }
 0x1ae   :  { %2240 = vmatprep.subr.mxu1 %v2453_v47  ;;  %2270 = vmatmul.mubr.msk.f32.vlgmr.msra.gmra.mxu0 %vm250_vm0, %v2436_v60  ;;  %v1704_v60 = vld [vmem:[%s3301_s4] sm:$0xff] }
 0x1af   :  { %2291 = vmatprep.subr.mxu0 %v2453_v47  ;;  %2241 = vmatpush3.msra.mxu1 %v1128_v45  ;;  %v1705_v45 = vld [vmem:[%s3301_s4 + $0x8] sm:$0xff] }
 0x1b0   :  { %2292 = vmatpush3.msra.mxu0 %v1377_v56  ;;  %2242 = vmatprep.subr.mxu1 %v2453_v47 }
 0x1b1   :  { %2293 = vmatprep.subr.mxu0 %v2453_v47  ;;  %2243 = vmatpush3.msra.mxu1 %v1127_v62 }
 0x1b2   :  { %2294 = vmatpush3.msra.mxu0 %v1376_v63  ;;  %2244 = vmatprep.subr.mxu1 %v2453_v47 }
 0x1b3   :  { %2295 = vmatprep.subr.mxu0 %v2453_v47  ;;  %2245 = vmatpush3.msra.mxu1 %v1126_v16 }
 0x1b4   :  { %2296 = vmatpush3.msra.mxu0 %v1375_v0  ;;  %2246 = vmatprep.subr.mxu1 %v2453_v47 }
 0x1b5   :  { %2297 = vmatprep.subr.mxu0 %v2453_v47  ;;  %2247 = vmatpush3.msra.mxu1 %v1125_v1 }
 0x1b6   :  { %2298 = vmatpush3.msra.mxu0 %v1374_v41  ;;  %2248 = vmatprep.subr.mxu1 %v2453_v47 }
 0x1b7   :  { %2299 = vmatprep.subr.mxu0 %v2453_v47  ;;  %2249 = vmatpush3.msra.mxu1 %v1124_v4 }
 0x1b8   :  { %2250 = vmatprep.mubr.msk.f32.mxu1 %vm2454_vm1, %v2453_v47  ;;  %2300 = vmatpush3.msra.mxu0 %v1373_v6 }
 0x1b9   :  { %2251 = vmatmul.mubr.msk.f32.vlgmr.msra.gmra.mxu1 %vm250_vm0, %v2438_v9  ;;  %2272 = vmatprep.subr.mxu1 %v2453_v47 }
 0x1ba   :  { %2301 = vmatprep.subr.mxu0 %v2453_v47  ;;  %2273 = vmatpush3.msra.mxu1 %v1295_v7 }
 0x1bb   :  { %2302 = vmatpush3.msra.mxu0 %v1372_v12  ;;  %2274 = vmatprep.subr.mxu1 %v2453_v47 }
 0x1bc   :  { %2303 = vmatprep.subr.mxu0 %v2453_v47  ;;  %2275 = vmatpush3.msra.mxu1 %v1294_v13 }
 0x1bd   :  { %2304 = vmatpush3.msra.mxu0 %v1371_v14  ;;  %2276 = vmatprep.subr.mxu1 %v2453_v47 }
 0x1be   :  { %2305 = vmatprep.subr.mxu0 %v2453_v47  ;;  %2277 = vmatpush3.msra.mxu1 %v1293_v15 }
 0x1bf   :  { %2306 = vmatpush3.msra.mxu0 %v1370_v48  ;;  %2307 = vmatprep.mubr.msk.f32.mxu0 %vm2454_vm1, %v2453_v47 }
 0x1c0   :  { %2278 = vmatprep.subr.mxu1 %v2453_v47  ;;  %2308 = vmatmul.mubr.msk.f32.vlgmr.msra.gmra.mxu0 %vm250_vm0, %v2440_v19 }
 0x1c1   :  { %2329 = vmatprep.subr.mxu0 %v2453_v47  ;;  %2279 = vmatpush3.msra.mxu1 %v1292_v18 }
 0x1c2   :  { %2330 = vmatpush3.msra.mxu0 %v1541_v20  ;;  %2280 = vmatprep.subr.mxu1 %v2453_v47 }
 0x1c3   :  { %2331 = vmatprep.subr.mxu0 %v2453_v47  ;;  %2281 = vmatpush3.msra.mxu1 %v1291_v43 }
 0x1c4   :  { %2332 = vmatpush3.msra.mxu0 %v1540_v3  ;;  %2282 = vmatprep.subr.mxu1 %v2453_v47 }
 0x1c5   :  { %2333 = vmatprep.subr.mxu0 %v2453_v47  ;;  %2283 = vmatpush3.msra.mxu1 %v1290_v17 }
 0x1c6   :  { %2334 = vmatpush3.msra.mxu0 %v1539_v21  ;;  %2284 = vmatprep.subr.mxu1 %v2453_v47 }
 0x1c7   :  { %2335 = vmatprep.subr.mxu0 %v2453_v47  ;;  %2285 = vmatpush3.msra.mxu1 %v1289_v22 }
 0x1c8   :  { %2336 = vmatpush3.msra.mxu0 %v1538_v26  ;;  %2286 = vmatprep.subr.mxu1 %v2453_v47 }
 0x1c9   :  { %2337 = vmatprep.subr.mxu0 %v2453_v47  ;;  %2287 = vmatpush3.msra.mxu1 %v1288_v11 }
 0x1ca   :  { %2288 = vmatprep.mubr.msk.f32.mxu1 %vm2454_vm1, %v2453_v47  ;;  %2338 = vmatpush3.msra.mxu0 %v1537_v24 }
 0x1cb   :  { %2289 = vmatmul.mubr.msk.f32.vlgmr.msra.gmra.mxu1 %vm250_vm0, %v2442_v27  ;;  %2310 = vmatprep.subr.mxu1 %v2453_v47 }
 0x1cc   :  { %2339 = vmatprep.subr.mxu0 %v2453_v47  ;;  %2311 = vmatpush3.msra.mxu1 %v1459_v25 }
 0x1cd   :  { %2340 = vmatpush3.msra.mxu0 %v1536_v28  ;;  %2312 = vmatprep.subr.mxu1 %v2453_v47  ;;  %v1700_v28 = vsub.s32 5, %v2592_v35 }
 0x1ce   :  { %2341 = vmatprep.subr.mxu0 %v2453_v47  ;;  %2313 = vmatpush3.msra.mxu1 %v1458_v29 }
 0x1cf   :  { %2342 = vmatpush3.msra.mxu0 %v1535_v30  ;;  %2314 = vmatprep.subr.mxu1 %v2453_v47  ;;  %v2451_v30 = vld [vmem:[%s3299_s1] sm:$0xff] }
 0x1d0   :  { %2343 = vmatprep.subr.mxu0 %v2453_v47  ;;  %2315 = vmatpush3.msra.mxu1 %v1457_v8  ;;  %v1701_v8 = vrot.slane %v2451_v30, %v1700_v28 }
 0x1d1   :  { %2344 = vmatpush3.msra.mxu0 %v1534_v31  ;;  %2345 = vmatprep.mubr.msk.f32.mxu0 %vm2454_vm1, %v2453_v47 }
 0x1d2   :  { %2316 = vmatprep.subr.mxu1 %v2453_v47  ;;  %2346 = vmatmul.mubr.msk.f32.vlgmr.msra.gmra.mxu0 %vm250_vm0, %v2444_v33 }
 0x1d3   :  { %2317 = vmatpush3.msra.mxu1 %v1456_v32  ;;  %2326 = vmatprep.mubr.msk.f32.mxu1 %vm2454_vm1, %v2453_v47 }
 0x1d4   :  { %2318 = vmatprep.subr.mxu1 %v2453_v47  ;;  %2367 = vmatprep.subr.mxu0 %v2453_v47 }
 0x1d5   :  { %2319 = vmatpush3.msra.mxu1 %v1455_v58  ;;  %2389 = vmatprep.mubr.msk.f32.mxu0 %vm2454_vm1, %v2453_v47 }
 0x1d6   :  { %2320 = vmatprep.subr.mxu1 %v2453_v47  ;;  %2368 = vmatpush3.msk.msra.mxu0 %vm1726_vm2, %v1714_v50 }
 0x1d7   :  { %2321 = vmatpush3.msra.mxu1 %v1454_v34  ;;  %2369 = vmatprep.subr.mxu0 %v2453_v47 }
 0x1d8   :  { %2322 = vmatprep.subr.mxu1 %v2453_v47  ;;  %2370 = vmatpush3.msra.mxu0 %v1713_v37 }
 0x1d9   :  { %2323 = vmatpush3.msra.mxu1 %v1453_v36  ;;  %2371 = vmatprep.subr.mxu0 %v2453_v47  ;;  %v1854_v36 = vld [vmem:[%s3302_s5] ss:$0 sm:$0xff] }
 0x1da   :  { %2324 = vmatprep.subr.mxu1 %v2453_v47  ;;  %2372 = vmatpush3.msra.mxu0 %v1712_v51 }
 0x1db   :  { %2325 = vmatpush3.msra.mxu1 %v1452_v38  ;;  %2373 = vmatprep.subr.mxu0 %v2453_v47 }
 0x1dc   :  { %2327 = vmatmul.mubr.msk.f32.vlgmr.msra.gmra.mxu1 %vm250_vm0, %v2446_v40  ;;  %2348 = vmatprep.subr.mxu1 %v2453_v47 }
 0x1dd   :  { %2349 = vmatpush3.msra.mxu1 %v1623_v39  ;;  %2364 = vmatprep.mubr.msk.f32.mxu1 %vm2454_vm1, %v2453_v47 }
 0x1de   :  { %2350 = vmatprep.subr.mxu1 %v2453_v47  ;;  %2374 = vmatpush3.msra.mxu0 %v1711_v52 }
 0x1df   :  { %2351 = vmatpush3.msra.mxu1 %v1622_v46  ;;  %2375 = vmatprep.subr.mxu0 %v2453_v47 }
 0x1e0   :  { %2352 = vmatprep.subr.mxu1 %v2453_v47  ;;  %2376 = vmatpush3.msra.mxu0 %v1710_v53 }
 0x1e1   :  { %2353 = vmatpush3.msra.mxu1 %v1621_v42  ;;  %2377 = vmatprep.subr.mxu0 %v2453_v47 }
 0x1e2   :  { %2354 = vmatprep.subr.mxu1 %v2453_v47  ;;  %2378 = vmatpush3.msra.mxu0 %v1709_v54 }
 0x1e3   :  { %2355 = vmatpush3.msra.mxu1 %v1620_v44  ;;  %2379 = vmatprep.subr.mxu0 %v2453_v47 }
 0x1e4   :  { %2356 = vmatprep.subr.mxu1 %v2453_v47  ;;  %2380 = vmatpush3.msra.mxu0 %v1708_v57 }
 0x1e5   :  { %2357 = vmatpush3.msra.mxu1 %v1619_v2  ;;  %2381 = vmatprep.subr.mxu0 %v2453_v47 }
 0x1e6   :  { %2358 = vmatprep.subr.mxu1 %v2453_v47  ;;  %2382 = vmatpush3.msra.mxu0 %v1707_v59 }
 0x1e7   :  { %2359 = vmatpush3.msra.mxu1 %v1618_v55  ;;  %2383 = vmatprep.subr.mxu0 %v2453_v47 }
 0x1e8   :  { %2360 = vmatprep.subr.mxu1 %v2453_v47  ;;  %2384 = vmatpush3.msra.mxu0 %v1706_v10 }
 0x1e9   :  { %2361 = vmatpush3.msra.mxu1 %v1617_v49  ;;  %2385 = vmatprep.subr.mxu0 %v2453_v47 }
 0x1ea   :  { %2362 = vmatprep.subr.mxu1 %v2453_v47  ;;  %2386 = vmatpush3.msra.mxu0 %v1705_v45 }
 0x1eb   :  { %2363 = vmatpush3.msra.mxu1 %v1616_v5  ;;  %2387 = vmatprep.subr.mxu0 %v2453_v47 }
 0x1ec   :  { %2365 = vmatmul.mubr.msk.f32.vlgmr.msra.gmra.mxu1 %vm250_vm0, %v2448_v23  ;;  %2388 = vmatpush3.msra.mxu0 %v1704_v60 }
 0x245   :  { %v801_v56 = vpop.f32.mrf.mxu1 }
 0x247   :  { %v2157_v61 = vpop.f32.mrf.mxu1 }
 0x24b   :  { %v955_v62 = vpop.f32.mrf.mxu0 }
 0x24d   :  { %v2195_v63 = vpop.f32.mrf.mxu0 }
 0x255   :  { %v874_v16 = vpop.f32.mrf.mxu1 }
 0x256   :  { %v875_v0 = vadd.f32 %v874_v16, %v801_v56 }
 0x257   :  { %v2176_v1 = vpop.f32.mrf.mxu1 }
 0x258   :  { %v959_v41 = vadd.f32 %v955_v62, %v875_v0 }
 0x25c   :  { %v1119_v4 = vpop.f32.mrf.mxu0 }
 0x25e   :  { %v2233_v6 = vpop.f32.mrf.mxu0 }
 0x267   :  { %v1037_v7 = vpop.f32.mrf.mxu1 }
 0x268   :  { %v1041_v9 = vadd.f32 %v1037_v7, %v959_v41 }
 0x269   :  { %v2214_v12 = vpop.f32.mrf.mxu1 }
 0x26a   :  { %v1123_v13 = vadd.f32 %v1119_v4, %v1041_v9 }
 0x26e   :  { %v1283_v14 = vpop.f32.mrf.mxu0 }
 0x270   :  { %v2271_v15 = vpop.f32.mrf.mxu0 }
 0x279   :  { %v1201_v48 = vpop.f32.mrf.mxu1 }
 0x27a   :  { %v1205_v21 = vadd.f32 %v1201_v48, %v1123_v13 }
 0x27b   :  { %v2252_v18 = vpop.f32.mrf.mxu1 }
 0x27c   :  { %v1287_v11 = vadd.f32 %v1283_v14, %v1205_v21 }
 0x280   :  { %v1447_v47 = vpop.f32.mrf.mxu0 }
 0x282   :  { %v2309_v19 = vpop.f32.mrf.mxu0 }
 0x28b   :  { %v1365_v20 = vpop.f32.mrf.mxu1 }
 0x28c   :  { %v1369_v24 = vadd.f32 %v1365_v20, %v1287_v11 }
 0x28d   :  { %v2290_v43 = vpop.f32.mrf.mxu1 }
 0x28e   :  { %v1451_v25 = vadd.f32 %v1447_v47, %v1369_v24 }
 0x292   :  { %v1611_v3 = vpop.f32.mrf.mxu0 }
 0x294   :  { %v2347_v17 = vpop.f32.mrf.mxu0 }
 0x29c   :  { %v1529_v22 = vpop.f32.mrf.mxu1 }
 0x29d   :  { %v1533_v27 = vadd.f32 %v1529_v22, %v1451_v25 }
 0x29e   :  { %v2328_v26 = vpop.f32.mrf.mxu1 }
 0x29f   :  { %v1615_v29 = vadd.f32 %v1611_v3, %v1533_v27 }
 0x2ac   :  { %v1693_v31 = vpop.f32.mrf.mxu1 }
 0x2ad   :  { %v1697_v32 = vadd.f32 %v1693_v31, %v1615_v29 }
 0x2ae   :  { %v2366_v33 = vpop.f32.mrf.mxu1 }
 0x2af   :  { %v1702_v58 = vadd.f32 %v1701_v8, %v1697_v32 }
 0x2b1   :  { %2449 = vtanh.f32 %v1702_v58 }
 0x2be   :  { %v2450_v34 = vpop.eup %2449 }
 0x2bf   :  { %2390 = vmatmul.mubr.msk.f32.vlgmr.msra.gmra.mxu0 %vm1722_vm3, %v2450_v34 }
 0x37f   :  { %v1796_v38 = vpop.f32.mrf.mxu0 }
 0x380   :  { %v1797_v35 = vadd.f32 %v1854_v36, %v1796_v38 }
 0x381   :  { %v2391_v39 = vpop.f32.mrf.mxu0 }
 0x382   :  { %1801 = vst.msk [vmem:[%s3303_s6] sm:$0xff] %vm1800_vm4, %v1797_v35 }

</bundles_post_ra>
